<compile_context>
chip_gen: v6e
topology: v6e:2x2x1
jax: 0.10.0
libtpu: 0.0.40
codegen_flags: <defaults>
</compile_context>

<pallas_src>
import jax
import jax.numpy as jnp
from jax import lax
from jax.experimental import pallas as pl
from jax.experimental.pallas import tpu as pltpu

IN_DIM = 28 * 28   # 784
HID = 64
OUT_DIM = 10
TB_MAX = 1024      # batch tile cap (fits v5e 16 MiB default scoped VMEM)
MIN_SPLIT = 256    # batches >= this always get >= 2 grid steps (v7x dual-TC)


def _cdiv(a, b):
    return -(-a // b)


def _round_up(n, m):
    return ((n + m - 1) // m) * m


def _tile_plan(B, tb_max, min_split):
    """Balanced batch tiling: (tb, b_pad)."""
    n = _cdiv(B, tb_max)
    if n == 1 and B >= min_split:
        n = 2                                   # use both TensorCores on v7x
    if n == 1:
        tb = _round_up(B, 8)                    # single tile: sublane-aligned
    else:
        tb = _round_up(_cdiv(B, n), 128)        # multi-tile: lane-dense out blocks
        n = _cdiv(B, tb)                        # re-balance after rounding
    return tb, n * tb


def _mlp_kernel(x_ref, w1_ref, b1_ref, w2_ref, b2_ref, w3_ref, b3_ref, o_ref):
    # One batch tile per grid step.  x arrives as f32 (no wrapper-side cast);
    # the bf16 cast runs on the VPU, fully hidden under the x DMA.
    x = x_ref[...].astype(jnp.bfloat16)                                   # (TB, 784)
    h1 = jnp.dot(x, w1_ref[...], preferred_element_type=jnp.float32) + b1_ref[...]
    h1 = jnp.maximum(h1, 0.0).astype(jnp.bfloat16)                        # (TB, 64)
    h2 = jnp.dot(h1, w2_ref[...], preferred_element_type=jnp.float32) + b2_ref[...]
    h2 = jnp.maximum(h2, 0.0).astype(jnp.bfloat16)                        # (TB, 64)
    # Transposed last layer: out[o, b] = sum_h w3t[o, h] * h2[b, h] + b3[o].
    # Batch lands on the lane axis -> lane-dense store of only 10 real rows.
    o = lax.dot_general(w3_ref[...], h2,
                        dimension_numbers=(((1,), (1,)), ((), ())),
                        preferred_element_type=jnp.float32)               # (10, TB)
    o_ref[...] = o + b3_ref[...]


def mynn_forward(x, params, *, tb_max=TB_MAX, min_split=MIN_SPLIT):
    """x: (B, 28, 28) float32 -> logits (B, 10) float32."""
    w1, b1, w2, b2, w3, b3 = params
    B = x.shape[0]

    # nn.Flatten.  Kept f32: the bf16 cast happens in-kernel.
    x_flat = x.reshape(B, IN_DIM)

    tb, b_pad = _tile_plan(B, tb_max, min_split)
    if b_pad != B:
        x_flat = jnp.pad(x_flat, ((0, b_pad - B), (0, 0)))

    # Weights: tiny (~200 KB total), VMEM-resident via constant index_maps.
    w1b = w1.astype(jnp.bfloat16)                 # (784, 64)
    w2b = w2.astype(jnp.bfloat16)                 # (64, 64)
    w3t = w3.T.astype(jnp.bfloat16)               # (10, 64) — transposed layer
    b3t = b3.reshape(OUT_DIM, 1)                  # (10, 1)  f32

    const = lambda shape: pl.BlockSpec(shape, lambda i: (0, 0))

    out_t = pl.pallas_call(
        _mlp_kernel,
        out_shape=jax.ShapeDtypeStruct((OUT_DIM, b_pad), jnp.float32),
        grid=(b_pad // tb,),
        in_specs=[
            pl.BlockSpec((tb, IN_DIM), lambda i: (i, 0)),   # x: tiled over batch (f32)
            const((IN_DIM, HID)), const((1, HID)),          # w1, b1: resident
            const((HID, HID)),    const((1, HID)),          # w2, b2: resident
            const((OUT_DIM, HID)), const((OUT_DIM, 1)),     # w3ᵀ, b3: resident
        ],
        out_specs=pl.BlockSpec((OUT_DIM, tb), lambda i: (0, i)),
        compiler_params=pltpu.CompilerParams(
            dimension_semantics=("parallel",)),              # v7x megacore sharding
    )(x_flat, w1b, b1, w2b, b2, w3t, b3t)

    return out_t[:, :B].T                                    # (B, 10) f32


def init_params(key):
    """Deterministic init mimicking nn.Linear default (U[-1/sqrt(fan_in), +])."""
    ks = jax.random.split(key, 6)

    def linear(kw, kb, fan_in, fan_out):
        bound = 1.0 / jnp.sqrt(fan_in)
        # stored as (in, out): transpose of PyTorch's (out, in)
        w = jax.random.uniform(kw, (fan_in, fan_out), jnp.float32, -bound, bound)
        b = jax.random.uniform(kb, (1, fan_out), jnp.float32, -bound, bound)
        return w, b

    w1, b1 = linear(ks[0], ks[1], IN_DIM, HID)
    w2, b2 = linear(ks[2], ks[3], HID, HID)
    w3, b3 = linear(ks[4], ks[5], HID, OUT_DIM)
    return (w1, b1, w2, b2, w3, b3)


def _reference_f32(x, params):
    w1, b1, w2, b2, w3, b3 = params
    h = x.reshape(x.shape[0], -1)
    h = jnp.maximum(h @ w1 + b1, 0.0)
    h = jnp.maximum(h @ w2 + b2, 0.0)
    return h @ w3 + b3


if __name__ == "__main__":
    key = jax.random.PRNGKey(0)
    k_x, k_p = jax.random.split(key)
    params = init_params(k_p)

    # 1) Small single-tile check (grid=(1,), no padding).
    B = 8
    x = jax.random.normal(k_x, (B, 28, 28), dtype=jnp.float32)
    logits = jax.block_until_ready(mynn_forward(x, params))
    assert logits.shape == (B, OUT_DIM) and logits.dtype == jnp.float32
    ref = _reference_f32(x, params)
    # bf16 matmuls + f32 accumulation -> loosen tolerance vs the f32 reference.
    assert jnp.allclose(logits, ref, atol=5e-2, rtol=5e-2), "mismatch vs reference (B=8)"

    # 2) Single-tile with batch padding (B=20 -> b_pad=24).
    B2 = 20
    x2 = jax.random.normal(jax.random.PRNGKey(1), (B2, 28, 28), dtype=jnp.float32)
    logits2 = jax.block_until_ready(mynn_forward(x2, params))
    assert logits2.shape == (B2, OUT_DIM)
    ref2 = _reference_f32(x2, params)
    assert jnp.allclose(logits2, ref2, atol=5e-2, rtol=5e-2), "mismatch vs reference (B=20)"

    # 3) Multi-step grid + lane-dense transposed output (B=200, 2 tiles of 128).
    B3 = 200
    x3 = jax.random.normal(jax.random.PRNGKey(2), (B3, 28, 28), dtype=jnp.float32)
    logits3 = jax.block_until_ready(mynn_forward(x3, params, tb_max=128))
    assert logits3.shape == (B3, OUT_DIM)
    ref3 = _reference_f32(x3, params)
    assert jnp.allclose(logits3, ref3, atol=5e-2, rtol=5e-2), "mismatch vs reference (B=200)"

    print("KERNEL_OK")
</pallas_src>

<mosaic_0001>
module attributes {stable_mosaic.version = 11 : i64} {
  func.func @_mlp_kernel(%arg0: i32, %arg1: memref<8x784xf32, #tpu.memory_space<vmem>>, %arg2: memref<784x64xbf16, #tpu.memory_space<vmem>>, %arg3: memref<1x64xf32, #tpu.memory_space<vmem>>, %arg4: memref<64x64xbf16, #tpu.memory_space<vmem>>, %arg5: memref<1x64xf32, #tpu.memory_space<vmem>>, %arg6: memref<10x64xbf16, #tpu.memory_space<vmem>>, %arg7: memref<10x1xf32, #tpu.memory_space<vmem>>, %arg8: memref<10x8xf32, #tpu.memory_space<vmem>>) attributes {dimension_semantics = [#tpu.dimension_semantics<parallel>], iteration_bounds = array<i64: 1>, scalar_prefetch = 0 : i64, scratch_operands = 0 : i64, tpu.core_type = #tpu.core_type<tc>, window_params = [{transform_indices = @transform_0, window_bounds = array<i64: 8, 784>}, {pipeline_mode = #tpu.pipeline_mode<synchronous>, transform_indices = @transform_1, window_bounds = array<i64: 784, 64>}, {pipeline_mode = #tpu.pipeline_mode<synchronous>, transform_indices = @transform_2, window_bounds = array<i64: 1, 64>}, {pipeline_mode = #tpu.pipeline_mode<synchronous>, transform_indices = @transform_3, window_bounds = array<i64: 64, 64>}, {pipeline_mode = #tpu.pipeline_mode<synchronous>, transform_indices = @transform_4, window_bounds = array<i64: 1, 64>}, {pipeline_mode = #tpu.pipeline_mode<synchronous>, transform_indices = @transform_5, window_bounds = array<i64: 10, 64>}, {pipeline_mode = #tpu.pipeline_mode<synchronous>, transform_indices = @transform_6, window_bounds = array<i64: 10, 1>}, {transform_indices = @transform_7, window_bounds = array<i64: 10, 8>}]} {
    %c0 = arith.constant 0 : index
    %c0_0 = arith.constant 0 : index
    %0 = vector.load %arg1[%c0, %c0_0] : memref<8x784xf32, #tpu.memory_space<vmem>>, vector<8x784xf32>
    %1 = arith.truncf %0 : vector<8x784xf32> to vector<8x784xbf16>
    %c0_1 = arith.constant 0 : index
    %c0_2 = arith.constant 0 : index
    %2 = vector.load %arg2[%c0_1, %c0_2] : memref<784x64xbf16, #tpu.memory_space<vmem>>, vector<784x64xbf16>
    %cst = arith.constant dense<0.000000e+00> : vector<8x64xf32>
    %3 = tpu.matmul %1, %2, %cst {dimension_numbers = #tpu.dot_dimension_numbers<[1], [0], [0], [1], [0, 0, 1, 1], [], []>} : vector<8x784xbf16>, vector<784x64xbf16>, vector<8x64xf32> -> vector<8x64xf32>
    %c0_3 = arith.constant 0 : index
    %c0_4 = arith.constant 0 : index
    %4 = vector.load %arg3[%c0_3, %c0_4] : memref<1x64xf32, #tpu.memory_space<vmem>>, vector<1x64xf32>
    %5 = vector.broadcast %4 : vector<1x64xf32> to vector<8x64xf32>
    %6 = arith.addf %3, %5 : vector<8x64xf32>
    %cst_5 = arith.constant 0.000000e+00 : f32
    %7 = vector.broadcast %cst_5 : f32 to vector<8x64xf32>
    %8 = arith.maximumf %6, %7 : vector<8x64xf32>
    %9 = arith.truncf %8 : vector<8x64xf32> to vector<8x64xbf16>
    %c0_6 = arith.constant 0 : index
    %c0_7 = arith.constant 0 : index
    %10 = vector.load %arg4[%c0_6, %c0_7] : memref<64x64xbf16, #tpu.memory_space<vmem>>, vector<64x64xbf16>
    %cst_8 = arith.constant dense<0.000000e+00> : vector<8x64xf32>
    %11 = tpu.matmul %9, %10, %cst_8 {dimension_numbers = #tpu.dot_dimension_numbers<[1], [0], [0], [1], [0, 0, 1, 1], [], []>} : vector<8x64xbf16>, vector<64x64xbf16>, vector<8x64xf32> -> vector<8x64xf32>
    %c0_9 = arith.constant 0 : index
    %c0_10 = arith.constant 0 : index
    %12 = vector.load %arg5[%c0_9, %c0_10] : memref<1x64xf32, #tpu.memory_space<vmem>>, vector<1x64xf32>
    %13 = vector.broadcast %12 : vector<1x64xf32> to vector<8x64xf32>
    %14 = arith.addf %11, %13 : vector<8x64xf32>
    %cst_11 = arith.constant 0.000000e+00 : f32
    %15 = vector.broadcast %cst_11 : f32 to vector<8x64xf32>
    %16 = arith.maximumf %14, %15 : vector<8x64xf32>
    %17 = arith.truncf %16 : vector<8x64xf32> to vector<8x64xbf16>
    %c0_12 = arith.constant 0 : index
    %c0_13 = arith.constant 0 : index
    %18 = vector.load %arg6[%c0_12, %c0_13] : memref<10x64xbf16, #tpu.memory_space<vmem>>, vector<10x64xbf16>
    %cst_14 = arith.constant dense<0.000000e+00> : vector<10x8xf32>
    %19 = tpu.matmul %18, %17, %cst_14 {dimension_numbers = #tpu.dot_dimension_numbers<[1], [1], [0], [0], [0, 0, 1, 0], [], []>} : vector<10x64xbf16>, vector<8x64xbf16>, vector<10x8xf32> -> vector<10x8xf32>
    %c0_15 = arith.constant 0 : index
    %c0_16 = arith.constant 0 : index
    %20 = vector.load %arg7[%c0_15, %c0_16] : memref<10x1xf32, #tpu.memory_space<vmem>>, vector<10x1xf32>
    %21 = vector.broadcast %20 : vector<10x1xf32> to vector<10x8xf32>
    %22 = arith.addf %19, %21 : vector<10x8xf32>
    %c0_17 = arith.constant 0 : index
    %c0_18 = arith.constant 0 : index
    %23 = vector.load %arg8[%c0_17, %c0_18] : memref<10x8xf32, #tpu.memory_space<vmem>>, vector<10x8xf32>
    tpu.vector_store %arg8[%c0_17, %c0_18], %22 {strides = array<i32>} : memref<10x8xf32, #tpu.memory_space<vmem>>, vector<10x8xf32>,
    return
  }
  func.func @transform_0(%arg0: i32) -> (i32, i32) {
    %c0_i32 = arith.constant 0 : i32
    %c0_i32_0 = arith.constant 0 : i32
    return %arg0, %c0_i32 : i32, i32
  }
  func.func @transform_1(%arg0: i32) -> (i32, i32) {
    %c0_i32 = arith.constant 0 : i32
    %c0_i32_0 = arith.constant 0 : i32
    %c0_i32_1 = arith.constant 0 : i32
    return %c0_i32, %c0_i32_0 : i32, i32
  }
  func.func @transform_2(%arg0: i32) -> (i32, i32) {
    %c0_i32 = arith.constant 0 : i32
    %c0_i32_0 = arith.constant 0 : i32
    %c0_i32_1 = arith.constant 0 : i32
    return %c0_i32, %c0_i32_0 : i32, i32
  }
  func.func @transform_3(%arg0: i32) -> (i32, i32) {
    %c0_i32 = arith.constant 0 : i32
    %c0_i32_0 = arith.constant 0 : i32
    %c0_i32_1 = arith.constant 0 : i32
    return %c0_i32, %c0_i32_0 : i32, i32
  }
  func.func @transform_4(%arg0: i32) -> (i32, i32) {
    %c0_i32 = arith.constant 0 : i32
    %c0_i32_0 = arith.constant 0 : i32
    %c0_i32_1 = arith.constant 0 : i32
    return %c0_i32, %c0_i32_0 : i32, i32
  }
  func.func @transform_5(%arg0: i32) -> (i32, i32) {
    %c0_i32 = arith.constant 0 : i32
    %c0_i32_0 = arith.constant 0 : i32
    %c0_i32_1 = arith.constant 0 : i32
    return %c0_i32, %c0_i32_0 : i32, i32
  }
  func.func @transform_6(%arg0: i32) -> (i32, i32) {
    %c0_i32 = arith.constant 0 : i32
    %c0_i32_0 = arith.constant 0 : i32
    %c0_i32_1 = arith.constant 0 : i32
    return %c0_i32, %c0_i32_0 : i32, i32
  }
  func.func @transform_7(%arg0: i32) -> (i32, i32) {
    %c0_i32 = arith.constant 0 : i32
    %c0_i32_0 = arith.constant 0 : i32
    return %c0_i32, %arg0 : i32, i32
  }
}

</mosaic_0001>

<bundles_post_ra>
// kernel: tpu_custom_call.1
= control target key start
LH: loop header
LB: loop body
LE: loop exit
PB: predicated region body
PF: predicated region fallthrough
CT: control target
= control target key end

     0   :  { %v981_v44 = vmov 0.0   ;;  %vm982_vm0 = vmmov 0   ;;  %vm440_vm1 = vcmask 130048   ;;  %vm645_vm2 = vcmask 523264   ;;  %s1240_s1 = inlined_call_operand.vmem [shape: bf16[784,64], index: 1, kind: input, shape index: {}]   ;;  %s1241_s0 = inlined_call_operand.vmem [shape: f32[8,784], index: 0, kind: input, shape index: {}]   ;;  %s1242_s3 = inlined_call_operand.vmem [shape: bf16[64,64], index: 3, kind: input, shape index: {}]   ;;  %s1243_s2 = inlined_call_operand.vmem [shape: f32[1,64], index: 2, kind: input, shape index: {}]   ;;  %s1244_s5 = inlined_call_operand.vmem [shape: bf16[10,64], index: 5, kind: input, shape index: {}]   ;;  %s1245_s6 = inlined_call_operand.vmem [shape: f32[10,1], index: 6, kind: input, shape index: {}]   ;;  %s1246_s4 = inlined_call_operand.vmem [shape: f32[1,64], index: 4, kind: input, shape index: {}]   ;;  %s1247_s7 = inlined_call_operand.vmem [shape: f32[10,8], index: 7, kind: output, shape index: {}]  }
   0x1   :  { %v927_v0 = vld [vmem:[%s1240_s1 + $0x78] sm:$0xff]   ;;  %v931_v4 = vld [vmem:[%s1240_s1 + $0x70] sm:$0xff]   ;;  %v935_v8 = vld [vmem:[%s1240_s1 + $0x68] sm:$0xff]   ;;  %vm757_vm3 = vcmask 64512   ;;  %vm759_vm4 = vcmask 58368  }
   0x2   :  { %v928_v1 = vld [vmem:[%s1240_s1 + $0x38] sm:$0xff]   ;;  %824 = vmatprep.subr.bf16.mxu0 %v927_v0  ;;  %v932_v5 = vld [vmem:[%s1240_s1 + $0x30] sm:$0xff]   ;;  %v936_v9 = vld [vmem:[%s1240_s1 + $0x28] sm:$0xff]  }
   0x3   :  { %v929_v2 = vld [vmem:[%s1240_s1 + $0xf8] sm:$0xff]   ;;  %825 = vmatpush3.bf16.msra.mxu0 %v928_v1  ;;  %v933_v6 = vld [vmem:[%s1240_s1 + $0xf0] sm:$0xff]   ;;  %v937_v10 = vld [vmem:[%s1240_s1 + $0xe8] sm:$0xff]  }
   0x4   :  { %v930_v3 = vld [vmem:[%s1240_s1 + $0xb8] sm:$0xff]   ;;  %846 = vmatprep.subr.bf16.mxu1 %v929_v2  ;;  %826 = vmatprep.subr.bf16.mxu0 %v931_v4  ;;  %v934_v7 = vld [vmem:[%s1240_s1 + $0xb0] sm:$0xff]   ;;  %v938_v11 = vld [vmem:[%s1240_s1 + $0xa8] sm:$0xff]  }
   0x5   :  { %847 = vmatpush3.bf16.msra.mxu1 %v930_v3  ;;  %v939_v12 = vld [vmem:[%s1240_s1 + $0x60] sm:$0xff]   ;;  %v943_v16 = vld [vmem:[%s1240_s1 + $0x58] sm:$0xff]   ;;  %v947_v20 = vld [vmem:[%s1240_s1 + $0x50] sm:$0xff]  }
   0x6   :  { %848 = vmatprep.subr.bf16.mxu1 %v933_v6  ;;  %v940_v13 = vld [vmem:[%s1240_s1 + $0x20] sm:$0xff]   ;;  %v944_v17 = vld [vmem:[%s1240_s1 + $0x18] sm:$0xff]   ;;  %v948_v21 = vld [vmem:[%s1240_s1 + $0x10] sm:$0xff]  }
   0x7   :  { %827 = vmatpush3.bf16.msra.mxu0 %v932_v5  ;;  %v941_v14 = vld [vmem:[%s1240_s1 + $0xe0] sm:$0xff]   ;;  %v945_v18 = vld [vmem:[%s1240_s1 + $0xd8] sm:$0xff]   ;;  %v949_v22 = vld [vmem:[%s1240_s1 + $0xd0] sm:$0xff]  }
   0x8   :  { %828 = vmatprep.subr.bf16.mxu0 %v935_v8  ;;  %v942_v15 = vld [vmem:[%s1240_s1 + $0xa0] sm:$0xff]   ;;  %v946_v19 = vld [vmem:[%s1240_s1 + $0x98] sm:$0xff]   ;;  %v950_v23 = vld [vmem:[%s1240_s1 + $0x90] sm:$0xff]  }
   0x9   :  { %849 = vmatpush3.bf16.msra.mxu1 %v934_v7  ;;  %v951_v24 = vld [vmem:[%s1240_s1 + $0x48] sm:$0xff]   ;;  %v955_v28 = vld [vmem:[%s1240_s1 + $0x40] sm:$0xff]   ;;  %v959_v36 = vld [vmem:[%s1240_s1 + $0x178] sm:$0xff]  }
   0xa   :  { %850 = vmatprep.subr.bf16.mxu1 %v937_v10  ;;  %v952_v25 = vld [vmem:[%s1240_s1 + $0x8] sm:$0xff]   ;;  %v956_v29 = vld [vmem:[%s1240_s1] sm:$0xff]   ;;  %v30_v37 = vld [vmem:[%s1241_s0 + $0x18] sm:$0xff] }
   0xb   :  { %829 = vmatpush3.bf16.msra.mxu0 %v936_v9  ;;  %v953_v26 = vld [vmem:[%s1240_s1 + $0xc8] sm:$0xff]   ;;  %v957_v30 = vld [vmem:[%s1240_s1 + $0xc0] sm:$0xff]   ;;  %v37_v38 = vpack.c.bf16 %v30_v37, %v30_v37  ;;  %v960_v39 = vld [vmem:[%s1240_s1 + $0x138] sm:$0xff]  }
   0xc   :  { %830 = vmatprep.subr.bf16.mxu0 %v939_v12  ;;  %v954_v27 = vld [vmem:[%s1240_s1 + $0x88] sm:$0xff]   ;;  %v958_v33 = vld [vmem:[%s1240_s1 + $0x80] sm:$0xff]   ;;  %v29_v40 = vld [vmem:[%s1241_s0 + $0x10] sm:$0xff] }
   0xd   :  { %851 = vmatpush3.bf16.msra.mxu1 %v938_v11  ;;  %v28_v31 = vld [vmem:[%s1241_s0 + $0x8] sm:$0xff]  ;;  %v27_v34 = vld [vmem:[%s1241_s0] sm:$0xff]  ;;  %516 = vmatprep.mubr.bf16.mxu1 %v37_v38  ;;  %v36_v41 = vpack.c.bf16 %v29_v40, %v29_v40  ;;  %v961_v42 = vld [vmem:[%s1240_s1 + $0x170] sm:$0xff]  }
   0xe   :  { %852 = vmatprep.subr.bf16.mxu1 %v941_v14  ;;  %v35_v32 = vpack.c.bf16 %v28_v31, %v28_v31  ;;  %v34_v35 = vpack.c.bf16 %v27_v34, %v27_v34  ;;  %v962_v43 = vld [vmem:[%s1240_s1 + $0x130] sm:$0xff]   ;;  %v963_v45 = vld [vmem:[%s1240_s1 + $0x168] sm:$0xff]   ;;  %v965_v47 = vld [vmem:[%s1240_s1 + $0x160] sm:$0xff]  }
   0xf   :  { %831 = vmatpush3.bf16.msra.mxu0 %v940_v13  ;;  %v964_v46 = vld [vmem:[%s1240_s1 + $0x128] sm:$0xff]   ;;  %v966_v48 = vld [vmem:[%s1240_s1 + $0x120] sm:$0xff]   ;;  %v967_v49 = vld [vmem:[%s1240_s1 + $0x158] sm:$0xff]  }
  0x10   :  { %832 = vmatprep.subr.bf16.mxu0 %v943_v16  ;;  %476 = vmatprep.mubr.bf16.mxu0 %v35_v32  ;;  %v968_v50 = vld [vmem:[%s1240_s1 + $0x118] sm:$0xff]   ;;  %v969_v51 = vld [vmem:[%s1240_s1 + $0x150] sm:$0xff]   ;;  %v975_v52 = vld [vmem:[%s1240_s1 + $0x180] sm:$0xff]  }
  0x11   :  { %853 = vmatpush3.bf16.msra.mxu1 %v942_v15  ;;  %v32_v53 = vld [vmem:[%s1241_s0 + $0x28] sm:$0xff]  ;;  %v33_v55 = vld [vmem:[%s1241_s0 + $0x30] sm:$0xff]  ;;  %v973_v60 = vld [vmem:[%s1240_s1 + $0x140] sm:$0xff]  }
  0x12   :  { %854 = vmatprep.subr.bf16.mxu1 %v945_v18  ;;  %v39_v54 = vpack.c.bf16 %v32_v53, %v32_v53  ;;  %v970_v56 = vld [vmem:[%s1240_s1 + $0x110] sm:$0xff]   ;;  %v40_v57 = vpack.c.bf16 %v33_v55, %v33_v55  ;;  %v971_v58 = vld [vmem:[%s1240_s1 + $0x148] sm:$0xff]   ;;  %v974_v61 = vld [vmem:[%s1240_s1 + $0x100] sm:$0xff]  }
  0x13   :  { %833 = vmatpush3.bf16.msra.mxu0 %v944_v17  ;;  %v972_v59 = vld [vmem:[%s1240_s1 + $0x108] sm:$0xff]   ;;  %v31_v62 = vld [vmem:[%s1241_s0 + $0x20] sm:$0xff]  ;;  %v976_v0 = vld [vmem:[%s1242_s3 + $0x18] sm:$0xff]  }
  0x14   :  { %834 = vmatprep.subr.bf16.mxu0 %v947_v20  ;;  %v38_v63 = vpack.c.bf16 %v31_v62, %v31_v62  ;;  %v977_v1 = vld [vmem:[%s1242_s3 + $0x10] sm:$0xff]   ;;  %v978_v2 = vld [vmem:[%s1242_s3 + $0x8] sm:$0xff]   ;;  %v979_v3 = vld [vmem:[%s1242_s3] sm:$0xff]  }
  0x15   :  { %855 = vmatpush3.bf16.msra.mxu1 %v946_v19  ;;  %v765_v17 = vld [vmem:[%s1243_s2] ss:$0 sm:$0xff]  ;;  %v694_v32 = vld [vmem:[%s1245_s6 + $0x8] sm:$0x3] }
  0x16   :  { %856 = vmatprep.subr.bf16.mxu1 %v949_v22  ;;  %v693_v31 = vld [vmem:[%s1245_s6] sm:$0xff] }
  0x17   :  { %835 = vmatpush3.bf16.msra.mxu0 %v948_v21 }
  0x18   :  { %836 = vmatprep.subr.bf16.mxu0 %v951_v24 }
  0x19   :  { %857 = vmatpush3.bf16.msra.mxu1 %v950_v23 }
  0x1a   :  { %858 = vmatprep.subr.bf16.mxu1 %v953_v26 }
  0x1b   :  { %837 = vmatpush3.bf16.msra.mxu0 %v952_v25 }
  0x1c   :  { %838 = vmatprep.subr.bf16.mxu0 %v955_v28 }
  0x1d   :  { %859 = vmatpush3.bf16.msra.mxu1 %v954_v27 }
  0x1e   :  { %860 = vmatprep.subr.bf16.mxu1 %v957_v30  ;;  %v983_v30 = vmov 0  }
  0x1f   :  { %839 = vmatpush3.bf16.msra.mxu0 %v956_v29  ;;  %926 = vset.pattern.permute.xlu0 %v983_v30 }
  0x20   :  { %868 = vmatprep.subr.bf16.mxu0 %v959_v36  ;;  %697 = vperm.xlu0 %926, %v693_v31  }
  0x21   :  { %861 = vmatpush3.bf16.msra.mxu1 %v958_v33  ;;  %v816_v33 = vld [vmem:[%s1246_s4] ss:$0 sm:$0xff] }
  0x22   :  { %477 = vmatmul.mubr.bf16.vlgmr.msra.gmra.mxu0 %v34_v35  ;;  %899 = vmatprep.subr.bf16.mxu1 %v981_v44 }
  0x23   :  { %869 = vmatpush3.bf16.msra.mxu0 %v960_v39  ;;  %556 = vmatprep.mubr.bf16.mxu0 %v39_v54 }
  0x24   :  { %517 = vmatmul.mubr.bf16.vlgmr.msra.gmra.mxu1 %v36_v41  ;;  %870 = vmatprep.subr.bf16.mxu0 %v961_v42  ;;  %v980_v42 = vld [vmem:[%s1244_s5] sm:$0x1f]  }
  0x25   :  { %901 = vmatprep.mubr.msk.bf16.mxu1 %vm982_vm0, %v981_v44  ;;  %900 = vmatpush3.bf16.msra.mxu1 %v975_v52 }
  0x26   :  { %905 = vmatprep.subr.bf16.mxu1 %v981_v44  ;;  %702 = vperm.xlu0 %926, %v694_v32  }
  0x27   :  { %871 = vmatpush3.bf16.msra.mxu0 %v962_v43 }
  0x28   :  { %872 = vmatprep.subr.bf16.mxu0 %v963_v45 }
  0x2b   :  { %873 = vmatpush3.bf16.msra.mxu0 %v964_v46 }
  0x2c   :  { %874 = vmatprep.subr.bf16.mxu0 %v965_v47  ;;  %902 = vmatmul.mubr.msk.bf16.vlgmr.msra.gmra.mxu1 %vm440_vm1, %v40_v57 }
  0x2d   :  { %913 = vmatprep.mubr.msk.bf16.mxu1 %vm982_vm0, %v981_v44  ;;  %906 = vmatpush3.bf16.msra.mxu1 %v976_v0 }
  0x2e   :  { %907 = vmatprep.subr.bf16.mxu1 %v981_v44 }
  0x2f   :  { %875 = vmatpush3.bf16.msra.mxu0 %v966_v48 }
  0x30   :  { %876 = vmatprep.subr.bf16.mxu0 %v967_v49 }
  0x31   :  { %908 = vmatpush3.bf16.msra.mxu1 %v977_v1 }
  0x32   :  { %909 = vmatprep.subr.bf16.mxu1 %v981_v44 }
  0x33   :  { %877 = vmatpush3.bf16.msra.mxu0 %v968_v50 }
  0x34   :  { %878 = vmatprep.subr.bf16.mxu0 %v969_v51 }
  0x35   :  { %910 = vmatpush3.bf16.msra.mxu1 %v978_v2 }
  0x36   :  { %911 = vmatprep.subr.bf16.mxu1 %v981_v44 }
  0x37   :  { %879 = vmatpush3.bf16.msra.mxu0 %v970_v56 }
  0x38   :  { %880 = vmatprep.subr.bf16.mxu0 %v971_v58 }
  0x39   :  { %912 = vmatpush3.bf16.msra.mxu1 %v979_v3 }
  0x3a   :  { %917 = vmatprep.subr.bf16.mxu1 %v981_v44 }
  0x3b   :  { %881 = vmatpush3.bf16.msra.mxu0 %v972_v59 }
  0x3c   :  { %882 = vmatprep.subr.bf16.mxu0 %v973_v60 }
  0x3f   :  { %883 = vmatpush3.bf16.msra.mxu0 %v974_v61 }
  0x42   :  { %557 = vmatmul.mubr.bf16.vlgmr.msra.gmra.mxu0 %v38_v63 }
  0x9b   :  { %v698_v43 = vpop.permute.xlu0 %697 }
  0xa1   :  { %v703_v47 = vpop.permute.xlu0 %702 }
  0xe2   :  { %v840_v4 = vpop.f32.mrf.mxu0 }
  0xe4   :  { %v841_v5 = vpop.f32.mrf.mxu0  ;;  %v862_v6 = vpop.f32.mrf.mxu1 }
  0xe5   :  { %v842_v16 = vadd.f32 %v841_v5, %v840_v4 }
  0xe6   :  { %v843_v7 = vpop.f32.mrf.mxu0  ;;  %v863_v8 = vpop.f32.mrf.mxu1 }
  0xe7   :  { %v479_v18 = vadd.f32 %v842_v16, %v765_v17  ;;  %v864_v19 = vadd.f32 %v863_v8, %v862_v6 }
  0xe8   :  { %v844_v9 = vpop.f32.mrf.mxu0  ;;  %v865_v10 = vpop.f32.mrf.mxu1 }
  0xe9   :  { %v519_v22 = vadd.f32 %v864_v19, %v479_v18 }
  0xea   :  { %v866_v11 = vpop.f32.mrf.mxu1 }
  0xec   :  { %v598_v12 = vpop.f32.mrf.mxu1 }
  0xee   :  { %v903_v13 = vpop.f32.mrf.mxu1 }
  0xf0   :  { %v601_v14 = vpop.f32.mrf.mxu1 }
  0xf2   :  { %v904_v15 = vpop.f32.mrf.mxu1 }
 0x102   :  { %v884_v20 = vpop.f32.mrf.mxu0 }
 0x104   :  { %v885_v21 = vpop.f32.mrf.mxu0 }
 0x105   :  { %v886_v23 = vadd.f32 %v885_v21, %v884_v20 }
 0x106   :  { %v887_v24 = vpop.f32.mrf.mxu0 }
 0x107   :  { %v559_v25 = vadd.f32 %v886_v23, %v519_v22 }
 0x108   :  { %v888_v26 = vpop.f32.mrf.mxu0 }
 0x109   :  { %v599_v27 = vadd.f32 %v598_v12, %v559_v25 }
 0x10b   :  { %v604_v28 = vmax.f32 %v599_v27, 0.0 }
 0x10d   :  { %v605_v29 = vpack.c.bf16 %v604_v28, %v604_v28 }
 0x10f   :  { %914 = vmatmul.mubr.msk.bf16.vlgmr.msra.gmra.mxu1 %vm645_vm2, %v605_v29 }
 0x110   :  { %919 = vmatprep.mubr.msk.bf16.mxu1 %vm982_vm0, %v981_v44 }
 0x1cf   :  { %v683_v34 = vpop.f32.mrf.mxu1 }
 0x1d0   :  { %v684_v35 = vadd.f32 %v816_v33, %v683_v34 }
 0x1d1   :  { %v915_v36 = vpop.f32.mrf.mxu1 }
 0x1d2   :  { %v689_v37 = vmax.f32 %v684_v35, 0.0 }
 0x1d3   :  { %v686_v38 = vpop.f32.mrf.mxu1 }
 0x1d4   :  { %v690_v39 = vpack.c.bf16 %v689_v37, %v689_v37 }
 0x1d5   :  { %v916_v40 = vpop.f32.mrf.mxu1 }
 0x1d6   :  { %v714_v41 = vsel %vm645_vm2, %v690_v39, 0 }
 0x1d7   :  { %918 = vmatpush3.bf16.xpose.msra.mxu1 %v714_v41 }
 0x1de   :  { %920 = vmatmul.mubr.msk.bf16.vlgmr.msra.gmra.mxu1 %vm645_vm2, %v980_v42 }
 0x29e   :  { %v750_v44 = vpop.f32.mrf.mxu1 }
 0x29f   :  { %v751_v45 = vadd.f32 %v750_v44, %v698_v43 }
 0x2a0   :  { %v921_v46 = vpop.f32.mrf.mxu1 }
 0x2a1   :  { %758 = vst.msk [vmem:[%s1247_s7] sm:$0xff] %vm757_vm3, %v751_v45 }
 0x2a2   :  { %v753_v48 = vpop.f32.mrf.mxu1 }
 0x2a3   :  { %v754_v49 = vadd.f32 %v753_v48, %v703_v47 }
 0x2a4   :  { %v922_v50 = vpop.f32.mrf.mxu1 }
 0x2a5   :  { %760 = vst.msk [vmem:[%s1247_s7 + $0x8] sm:$0x3] %vm759_vm4, %v754_v49 }

</bundles_post_ra>
